<compile_context>
chip_gen: v7x
topology: tpu7x:2x2x1
jax: 0.10.0
libtpu: 0.0.40
codegen_flags: <defaults>
</compile_context>

<pallas_src>
import jax
import jax.numpy as jnp
from jax.experimental import pallas as pl
from jax.experimental.pallas import tpu as pltpu

WIDTH = 128  # padded lane width for all hidden layers / output


def dqn_kernel(x_ref, w1_ref, w_ref, b_ref, out_ref):
    # x_ref : (TB, state_dim)         f32
    # w1_ref: (state_dim, WIDTH)      bf16  (fc1 weight, output cols zero-padded)
    # w_ref : (n_layers-1, W, W)      bf16  (fc2..fc6 weights, zero-padded)
    # b_ref : (n_layers, WIDTH)       f32   (biases, zero-padded)
    # out_ref: (TB, WIDTH)            f32   (lane-dense; cols >= action_dim are 0)
    x = x_ref[...].astype(jnp.bfloat16)
    h = jnp.dot(x, w1_ref[...], preferred_element_type=jnp.float32)
    h = jnp.maximum(h + b_ref[0:1, :], 0.0)

    n_rest = w_ref.shape[0]
    for j in range(n_rest):  # static unroll over 5 remaining layers
        y = jnp.dot(h.astype(jnp.bfloat16), w_ref[j],
                    preferred_element_type=jnp.float32)
        y = y + b_ref[j + 1:j + 2, :]
        h = jnp.maximum(y, 0.0) if j < n_rest - 1 else y

    out_ref[...] = h.astype(out_ref.dtype)


def dqn_forward(state, params, *, tb_max=512):
    """state: (B, state_dim) f32; params: list of (W, b) with W (in, out), b (out,)."""
    B, state_dim = state.shape
    n_layers = len(params)
    action_dim = params[-1][0].shape[1]

    # ---- pack weights / biases (zero-padded to WIDTH lanes) ----
    w1 = jnp.zeros((state_dim, WIDTH), jnp.float32)
    w1 = w1.at[:, :params[0][0].shape[1]].set(params[0][0])
    w_rest = jnp.zeros((n_layers - 1, WIDTH, WIDTH), jnp.float32)
    b_all = jnp.zeros((n_layers, WIDTH), jnp.float32)
    b_all = b_all.at[0, :params[0][1].shape[-1]].set(params[0][1].reshape(-1))
    for i, (w, b) in enumerate(params[1:], start=1):
        w_rest = w_rest.at[i - 1, :w.shape[0], :w.shape[1]].set(w)
        b_all = b_all.at[i, :b.shape[-1]].set(b.reshape(-1))
    w1 = w1.astype(jnp.bfloat16)
    w_rest = w_rest.astype(jnp.bfloat16)

    # ---- batch tiling: biggest tile that fits, rounded to sublane multiple ----
    if B >= tb_max:
        tb = tb_max
    else:
        tb = max(8, ((B + 7) // 8) * 8)
    b_pad = pl.cdiv(B, tb) * tb
    x = state if b_pad == B else jnp.pad(state, ((0, b_pad - B), (0, 0)))

    out = pl.pallas_call(
        dqn_kernel,
        out_shape=jax.ShapeDtypeStruct((b_pad, WIDTH), jnp.float32),
        grid=(b_pad // tb,),
        in_specs=[
            pl.BlockSpec((tb, state_dim), lambda i: (i, 0)),              # streamed
            pl.BlockSpec((state_dim, WIDTH), lambda i: (0, 0)),           # resident
            pl.BlockSpec((n_layers - 1, WIDTH, WIDTH), lambda i: (0, 0, 0)),  # resident
            pl.BlockSpec((n_layers, WIDTH), lambda i: (0, 0)),            # resident
        ],
        out_specs=pl.BlockSpec((tb, WIDTH), lambda i: (i, 0)),
        compiler_params=pltpu.CompilerParams(
            dimension_semantics=("parallel",)),
    )(x, w1, w_rest, b_all)

    return out[:B, :action_dim]


def xavier_uniform(key, fan_in, fan_out):
    # Matches torch.nn.init.xavier_uniform_ bound; deterministic via PRNGKey.
    limit = (6.0 / (fan_in + fan_out)) ** 0.5
    return jax.random.uniform(key, (fan_in, fan_out), jnp.float32, -limit, limit)


def make_params(key, state_dim, action_dim):
    dims = [state_dim, 32, 64, 128, 64, 32, action_dim]
    params = []
    keys = jax.random.split(key, len(dims) - 1)
    for k, d_in, d_out in zip(keys, dims[:-1], dims[1:]):
        w = xavier_uniform(k, d_in, d_out)
        b = jnp.zeros((d_out,), jnp.float32)  # constant 0.0 bias
        params.append((w, b))
    return params


def dqn_reference(state, params):
    # Same bf16-operand / f32-accumulate numerics as the kernel.
    h = state
    for i, (w, b) in enumerate(params):
        h = jnp.dot(h.astype(jnp.bfloat16), w.astype(jnp.bfloat16),
                    preferred_element_type=jnp.float32) + b.reshape(1, -1)
        if i < len(params) - 1:
            h = jnp.maximum(h, 0.0)
    return h


if __name__ == "__main__":
    key = jax.random.PRNGKey(0)
    k_param, k_state = jax.random.split(key)

    B, state_dim, action_dim = 2, 8, 4
    params = make_params(k_param, state_dim, action_dim)
    state = jax.random.normal(k_state, (B, state_dim), jnp.float32)

    q = dqn_forward(state, params)
    q = jax.block_until_ready(q)

    q_ref = dqn_reference(state, params)
    assert q.shape == (B, action_dim)
    assert jnp.allclose(q, q_ref, atol=1e-3, rtol=1e-3), (
        f"max abs err {jnp.max(jnp.abs(q - q_ref))}")

    print("KERNEL_OK")
</pallas_src>

<mosaic_0001>
module attributes {stable_mosaic.version = 11 : i64} {
  func.func @dqn_kernel(%arg0: i32, %arg1: memref<8x8xf32, #tpu.memory_space<vmem>>, %arg2: memref<8x128xbf16, #tpu.memory_space<vmem>>, %arg3: memref<5x128x128xbf16, #tpu.memory_space<vmem>>, %arg4: memref<6x128xf32, #tpu.memory_space<vmem>>, %arg5: memref<8x128xf32, #tpu.memory_space<vmem>>) attributes {dimension_semantics = [#tpu.dimension_semantics<parallel>], iteration_bounds = array<i64: 1>, scalar_prefetch = 0 : i64, scratch_operands = 0 : i64, tpu.core_type = #tpu.core_type<tc>, window_params = [{transform_indices = @transform_0, window_bounds = array<i64: 8, 8>}, {pipeline_mode = #tpu.pipeline_mode<synchronous>, transform_indices = @transform_1, window_bounds = array<i64: 8, 128>}, {pipeline_mode = #tpu.pipeline_mode<synchronous>, transform_indices = @transform_2, window_bounds = array<i64: 5, 128, 128>}, {pipeline_mode = #tpu.pipeline_mode<synchronous>, transform_indices = @transform_3, window_bounds = array<i64: 6, 128>}, {transform_indices = @transform_4, window_bounds = array<i64: 8, 128>}]} {
    %c0 = arith.constant 0 : index
    %c0_0 = arith.constant 0 : index
    %0 = vector.load %arg1[%c0, %c0_0] : memref<8x8xf32, #tpu.memory_space<vmem>>, vector<8x8xf32>
    %1 = arith.truncf %0 : vector<8x8xf32> to vector<8x8xbf16>
    %c0_1 = arith.constant 0 : index
    %c0_2 = arith.constant 0 : index
    %2 = vector.load %arg2[%c0_1, %c0_2] : memref<8x128xbf16, #tpu.memory_space<vmem>>, vector<8x128xbf16>
    %cst = arith.constant dense<0.000000e+00> : vector<8x128xf32>
    %3 = tpu.matmul %1, %2, %cst {dimension_numbers = #tpu.dot_dimension_numbers<[1], [0], [0], [1], [0, 0, 1, 1], [], []>} : vector<8x8xbf16>, vector<8x128xbf16>, vector<8x128xf32> -> vector<8x128xf32>
    %c0_3 = arith.constant 0 : index
    %c0_4 = arith.constant 0 : index
    %4 = vector.load %arg4[%c0_3, %c0_4] : memref<6x128xf32, #tpu.memory_space<vmem>>, vector<1x128xf32>
    %5 = vector.broadcast %4 : vector<1x128xf32> to vector<8x128xf32>
    %6 = arith.addf %3, %5 : vector<8x128xf32>
    %cst_5 = arith.constant 0.000000e+00 : f32
    %7 = vector.broadcast %cst_5 : f32 to vector<8x128xf32>
    %8 = arith.maximumf %6, %7 : vector<8x128xf32>
    %9 = arith.truncf %8 : vector<8x128xf32> to vector<8x128xbf16>
    %c0_6 = arith.constant 0 : index
    %c0_7 = arith.constant 0 : index
    %c0_8 = arith.constant 0 : index
    %10 = vector.load %arg3[%c0_6, %c0_7, %c0_8] : memref<5x128x128xbf16, #tpu.memory_space<vmem>>, vector<1x128x128xbf16>
    %11 = vector.shape_cast %10 : vector<1x128x128xbf16> to vector<128x128xbf16>
    %cst_9 = arith.constant dense<0.000000e+00> : vector<8x128xf32>
    %12 = tpu.matmul %9, %11, %cst_9 {dimension_numbers = #tpu.dot_dimension_numbers<[1], [0], [0], [1], [0, 0, 1, 1], [], []>} : vector<8x128xbf16>, vector<128x128xbf16>, vector<8x128xf32> -> vector<8x128xf32>
    %c1 = arith.constant 1 : index
    %c0_10 = arith.constant 0 : index
    %13 = vector.load %arg4[%c1, %c0_10] : memref<6x128xf32, #tpu.memory_space<vmem>>, vector<1x128xf32>
    %14 = vector.broadcast %13 : vector<1x128xf32> to vector<8x128xf32>
    %15 = arith.addf %12, %14 : vector<8x128xf32>
    %cst_11 = arith.constant 0.000000e+00 : f32
    %16 = vector.broadcast %cst_11 : f32 to vector<8x128xf32>
    %17 = arith.maximumf %15, %16 : vector<8x128xf32>
    %18 = arith.truncf %17 : vector<8x128xf32> to vector<8x128xbf16>
    %c1_12 = arith.constant 1 : index
    %c0_13 = arith.constant 0 : index
    %c0_14 = arith.constant 0 : index
    %19 = vector.load %arg3[%c1_12, %c0_13, %c0_14] : memref<5x128x128xbf16, #tpu.memory_space<vmem>>, vector<1x128x128xbf16>
    %20 = vector.shape_cast %19 : vector<1x128x128xbf16> to vector<128x128xbf16>
    %cst_15 = arith.constant dense<0.000000e+00> : vector<8x128xf32>
    %21 = tpu.matmul %18, %20, %cst_15 {dimension_numbers = #tpu.dot_dimension_numbers<[1], [0], [0], [1], [0, 0, 1, 1], [], []>} : vector<8x128xbf16>, vector<128x128xbf16>, vector<8x128xf32> -> vector<8x128xf32>
    %c2 = arith.constant 2 : index
    %c0_16 = arith.constant 0 : index
    %22 = vector.load %arg4[%c2, %c0_16] : memref<6x128xf32, #tpu.memory_space<vmem>>, vector<1x128xf32>
    %23 = vector.broadcast %22 : vector<1x128xf32> to vector<8x128xf32>
    %24 = arith.addf %21, %23 : vector<8x128xf32>
    %cst_17 = arith.constant 0.000000e+00 : f32
    %25 = vector.broadcast %cst_17 : f32 to vector<8x128xf32>
    %26 = arith.maximumf %24, %25 : vector<8x128xf32>
    %27 = arith.truncf %26 : vector<8x128xf32> to vector<8x128xbf16>
    %c2_18 = arith.constant 2 : index
    %c0_19 = arith.constant 0 : index
    %c0_20 = arith.constant 0 : index
    %28 = vector.load %arg3[%c2_18, %c0_19, %c0_20] : memref<5x128x128xbf16, #tpu.memory_space<vmem>>, vector<1x128x128xbf16>
    %29 = vector.shape_cast %28 : vector<1x128x128xbf16> to vector<128x128xbf16>
    %cst_21 = arith.constant dense<0.000000e+00> : vector<8x128xf32>
    %30 = tpu.matmul %27, %29, %cst_21 {dimension_numbers = #tpu.dot_dimension_numbers<[1], [0], [0], [1], [0, 0, 1, 1], [], []>} : vector<8x128xbf16>, vector<128x128xbf16>, vector<8x128xf32> -> vector<8x128xf32>
    %c3 = arith.constant 3 : index
    %c0_22 = arith.constant 0 : index
    %31 = vector.load %arg4[%c3, %c0_22] : memref<6x128xf32, #tpu.memory_space<vmem>>, vector<1x128xf32>
    %32 = vector.broadcast %31 : vector<1x128xf32> to vector<8x128xf32>
    %33 = arith.addf %30, %32 : vector<8x128xf32>
    %cst_23 = arith.constant 0.000000e+00 : f32
    %34 = vector.broadcast %cst_23 : f32 to vector<8x128xf32>
    %35 = arith.maximumf %33, %34 : vector<8x128xf32>
    %36 = arith.truncf %35 : vector<8x128xf32> to vector<8x128xbf16>
    %c3_24 = arith.constant 3 : index
    %c0_25 = arith.constant 0 : index
    %c0_26 = arith.constant 0 : index
    %37 = vector.load %arg3[%c3_24, %c0_25, %c0_26] : memref<5x128x128xbf16, #tpu.memory_space<vmem>>, vector<1x128x128xbf16>
    %38 = vector.shape_cast %37 : vector<1x128x128xbf16> to vector<128x128xbf16>
    %cst_27 = arith.constant dense<0.000000e+00> : vector<8x128xf32>
    %39 = tpu.matmul %36, %38, %cst_27 {dimension_numbers = #tpu.dot_dimension_numbers<[1], [0], [0], [1], [0, 0, 1, 1], [], []>} : vector<8x128xbf16>, vector<128x128xbf16>, vector<8x128xf32> -> vector<8x128xf32>
    %c4 = arith.constant 4 : index
    %c0_28 = arith.constant 0 : index
    %40 = vector.load %arg4[%c4, %c0_28] : memref<6x128xf32, #tpu.memory_space<vmem>>, vector<1x128xf32>
    %41 = vector.broadcast %40 : vector<1x128xf32> to vector<8x128xf32>
    %42 = arith.addf %39, %41 : vector<8x128xf32>
    %cst_29 = arith.constant 0.000000e+00 : f32
    %43 = vector.broadcast %cst_29 : f32 to vector<8x128xf32>
    %44 = arith.maximumf %42, %43 : vector<8x128xf32>
    %45 = arith.truncf %44 : vector<8x128xf32> to vector<8x128xbf16>
    %c4_30 = arith.constant 4 : index
    %c0_31 = arith.constant 0 : index
    %c0_32 = arith.constant 0 : index
    %46 = vector.load %arg3[%c4_30, %c0_31, %c0_32] : memref<5x128x128xbf16, #tpu.memory_space<vmem>>, vector<1x128x128xbf16>
    %47 = vector.shape_cast %46 : vector<1x128x128xbf16> to vector<128x128xbf16>
    %cst_33 = arith.constant dense<0.000000e+00> : vector<8x128xf32>
    %48 = tpu.matmul %45, %47, %cst_33 {dimension_numbers = #tpu.dot_dimension_numbers<[1], [0], [0], [1], [0, 0, 1, 1], [], []>} : vector<8x128xbf16>, vector<128x128xbf16>, vector<8x128xf32> -> vector<8x128xf32>
    %c5 = arith.constant 5 : index
    %c0_34 = arith.constant 0 : index
    %49 = vector.load %arg4[%c5, %c0_34] : memref<6x128xf32, #tpu.memory_space<vmem>>, vector<1x128xf32>
    %50 = vector.broadcast %49 : vector<1x128xf32> to vector<8x128xf32>
    %51 = arith.addf %48, %50 : vector<8x128xf32>
    %c0_35 = arith.constant 0 : index
    %c0_36 = arith.constant 0 : index
    %52 = vector.load %arg5[%c0_35, %c0_36] : memref<8x128xf32, #tpu.memory_space<vmem>>, vector<8x128xf32>
    tpu.vector_store %arg5[%c0_35, %c0_36], %51 {strides = array<i32>} : memref<8x128xf32, #tpu.memory_space<vmem>>, vector<8x128xf32>,
    return
  }
  func.func @transform_0(%arg0: i32) -> (i32, i32) {
    %c0_i32 = arith.constant 0 : i32
    %c0_i32_0 = arith.constant 0 : i32
    return %arg0, %c0_i32 : i32, i32
  }
  func.func @transform_1(%arg0: i32) -> (i32, i32) {
    %c0_i32 = arith.constant 0 : i32
    %c0_i32_0 = arith.constant 0 : i32
    %c0_i32_1 = arith.constant 0 : i32
    return %c0_i32, %c0_i32_0 : i32, i32
  }
  func.func @transform_2(%arg0: i32) -> (i32, i32, i32) {
    %c0_i32 = arith.constant 0 : i32
    %c0_i32_0 = arith.constant 0 : i32
    %c0_i32_1 = arith.constant 0 : i32
    %c0_i32_2 = arith.constant 0 : i32
    return %c0_i32, %c0_i32_0, %c0_i32_1 : i32, i32, i32
  }
  func.func @transform_3(%arg0: i32) -> (i32, i32) {
    %c0_i32 = arith.constant 0 : i32
    %c0_i32_0 = arith.constant 0 : i32
    %c0_i32_1 = arith.constant 0 : i32
    return %c0_i32, %c0_i32_0 : i32, i32
  }
  func.func @transform_4(%arg0: i32) -> (i32, i32) {
    %c0_i32 = arith.constant 0 : i32
    %c0_i32_0 = arith.constant 0 : i32
    return %arg0, %c0_i32 : i32, i32
  }
}

</mosaic_0001>

<bundles_post_ra>
// kernel: tpu_custom_call.1
= control target key start
LH: loop header
LB: loop body
LE: loop exit
PB: predicated region body
PF: predicated region fallthrough
CT: control target
= control target key end

     0   :  { %9 = vsyncpa [#allocation3], 0  ;;  %s1182_s0 = inlined_call_operand.hbm [shape: f32[8,8], index: 0, kind: input, shape index: {}]   ;;  %s1183_s1 = inlined_call_operand.hbm [shape: bf16[8,128], index: 1, kind: input, shape index: {}]   ;;  %s1184_s2 = inlined_call_operand.hbm [shape: bf16[5,128,128], index: 2, kind: input, shape index: {}]   ;;  %s1185_s3 = inlined_call_operand.vmem [shape: f32[6,128], index: 3, kind: input, shape index: {}]   ;;  %s1186_s4 = inlined_call_operand.hbm [shape: f32[8,128], index: 4, kind: output, shape index: {}]  }
   0x1   :  { %10 = vsyncpa [#allocation6], 0 }
   0x2   :  { %11 = vsyncpa [#allocation4], 0  ;;  %s1030_s15 = smov [#allocation5]   ;;  %s1031_s17 = smov [#allocation2]  }
   0x3   :  { %s28_s16 = sshll.u32 %s1030_s15, 4  ;;  %s18_s18 = sshll.u32 %s1031_s17, 4  ;;  %s29_s16 = int_to_ptr.vmem [resolvable:$true] %s28_s16  ;;  %s19_s18 = int_to_ptr.vmem [resolvable:$true] %s18_s18 }
   0x4   :  { %s936_s21 = scalar_lea.hbm %s1183_s1, 64 }
   0x5   :  { %p937_p0 = scmp.ne.s32.totalorder %s1183_s1, %s936_s21  ;;  %p940_p1 = scmp.lt.u32.totalorder %s936_s21, %s1183_s1 }
   0x7   :  { %p942_p2 = pnand %p940_p1, %p937_p0 }
   0x9   :  { %945 = shalt.err (!%p942_p2)
}
   0xa   :  { %s946_s26 = scalar_lea.vmem %s29_s16, 64  ;;  %p951_p4 = scmp.lt.s32.totalorder %s29_s16, %s29_s16 }
   0xb   :  { %p947_p3 = scmp.ne.s32.totalorder %s29_s16, %s946_s26  ;;  %p952_p5 = scmp.lt.s32.totalorder %s946_s26, %s946_s26 }
   0xd   :  { %p953_p6 = por %p952_p5, %p951_p4 }
   0xf   :  { %p954_p7 = pnand %p953_p6, %p947_p3 }
  0x11   :  { %957 = shalt.err (!%p954_p7)
}
  0x12   :  { %31 = dma.hbm_to_vmem [thread:$0]  %s1183_s1, 64, %s29_s16, [#allocation6]  }
  0x13   :  { %s958_s5 = scalar_lea.hbm %s1182_s0, 128 }
  0x14   :  { %p959_p8 = scmp.ne.s32.totalorder %s1182_s0, %s958_s5  ;;  %p962_p9 = scmp.lt.u32.totalorder %s958_s5, %s1182_s0 }
  0x16   :  { %p964_p10 = pnand %p962_p9, %p959_p8 }
  0x18   :  { %967 = shalt.err (!%p964_p10)
}
  0x19   :  { %s968_s10 = scalar_lea.vmem %s19_s18, 128  ;;  %p973_p12 = scmp.lt.s32.totalorder %s19_s18, %s19_s18 }
  0x1a   :  { %p969_p11 = scmp.ne.s32.totalorder %s19_s18, %s968_s10  ;;  %p974_p13 = scmp.lt.s32.totalorder %s968_s10, %s968_s10 }
  0x1c   :  { %p975_p0 = por %p974_p13, %p973_p12 }
  0x1e   :  { %p976_p1 = pnand %p975_p0, %p969_p11 }
  0x20   :  { %979 = shalt.err (!%p976_p1)
}
  0x21   :  { %21 = dma.hbm_to_vmem [thread:$0]  %s1182_s0, 128, %s19_s18, [#allocation3]  }
  0x22   :  { %s1032_s12 = smov [#allocation7]   ;;  %s980_s16 = scalar_lea.hbm %s1184_s2, 5120 }
  0x23   :  { %s37_s13 = sshll.u32 %s1032_s12, 4  ;;  %p981_p2 = scmp.ne.s32.totalorder %s1184_s2, %s980_s16  ;;  %s38_s13 = int_to_ptr.vmem [resolvable:$true] %s37_s13 }
  0x24   :  { %p984_p3 = scmp.lt.u32.totalorder %s980_s16, %s1184_s2 }
  0x26   :  { %p986_p4 = pnand %p984_p3, %p981_p2 }
  0x28   :  { %989 = shalt.err (!%p986_p4)
}
  0x29   :  { %s990_s22 = scalar_lea.vmem %s38_s13, 5120  ;;  %p995_p6 = scmp.lt.s32.totalorder %s38_s13, %s38_s13 }
  0x2a   :  { %p991_p5 = scmp.ne.s32.totalorder %s38_s13, %s990_s22  ;;  %p996_p7 = scmp.lt.s32.totalorder %s990_s22, %s990_s22 }
  0x2c   :  { %p997_p8 = por %p996_p7, %p995_p6 }
  0x2e   :  { %p998_p9 = pnand %p997_p8, %p991_p5 }
  0x30   :  { %1001 = shalt.err (!%p998_p9)
}
  0x31   :  { %s1033_s0 = smov 64   ;;  %s1034_s18 = smov 4  }
  0x32   :  { %43 = dma.hbm_to_vmem [thread:$0]  %s1184_s2, 5120, %s38_s13, [#allocation6], %s1033_s0, %s1033_s0, %s1034_s18  }
  0x33   :  { %1024 = dma.done.wait [#allocation3], 128  }
  0x34   :  { %1025 = vsyncadd [#allocation3], 4294967168 }
  0x35   :  { %1026 = dma.done.wait [#allocation6], 5184  }
  0x36   :  { %1027 = vsyncadd [#allocation6], 4294962112  ;;  %v1035_v0 = vmov 0.0   ;;  %vm1036_vm0 = vmmov 0   ;;  %vm68_vm1 = vcmask 1043456   ;;  %v56_v2 = vld [vmem:[#allocation2] sm:$0xff] }
  0x37   :  { %782 = vmatprep.subr.bf16.mxu0 %v1035_v0  ;;  %784 = vmatprep.mubr.msk.bf16.mxu0 %vm1036_vm0, %v1035_v0  ;;  %v58_v1 = vld [vmem:[#allocation5] sm:$0xf]  ;;  %v57_v4 = vpack.c.bf16 %v56_v2, %v56_v2  ;;  %v896_v5 = vld [vmem:[#allocation7] sm:$0xff]   ;;  %vm64_vm2 = vcmask 64512   ;;  %v897_v6 = vld [vmem:[#allocation7 + $0x8] sm:$0xff]   ;;  %s1037_s10 = smov [#allocation8]  }
  0x38   :  { %788 = vmatprep.subr.bf16.mxu1 %v1035_v0  ;;  %804 = vmatprep.mubr.msk.bf16.mxu1 %vm1036_vm0, %v1035_v0  ;;  %v70_v3 = vsel %vm68_vm1, %v58_v1, 0  ;;  %v898_v7 = vld [vmem:[#allocation7 + $0x10] sm:$0xff]   ;;  %v899_v8 = vld [vmem:[#allocation7 + $0x18] sm:$0xff]   ;;  %v900_v9 = vld [vmem:[#allocation7 + $0x20] sm:$0xff]   ;;  %s678_s1 = sshll.u32 %s1037_s10, 4  ;;  %s679_s1 = int_to_ptr.vmem [resolvable:$true] %s678_s1 }
  0x39   :  { %783 = vmatpush3.bf16.msra.mxu0 %v70_v3  ;;  %789 = vmatpush3.bf16.msra.mxu1 %v896_v5  ;;  %v901_v10 = vld [vmem:[#allocation7 + $0x28] sm:$0xff]   ;;  %v902_v11 = vld [vmem:[#allocation7 + $0x30] sm:$0xff]   ;;  %v903_v12 = vld [vmem:[#allocation7 + $0x38] sm:$0xff]   ;;  %s1002_s11 = scalar_lea.vmem %s679_s1, 128  ;;  %p1007_p11 = scmp.lt.s32.totalorder %s679_s1, %s679_s1 }
  0x3a   :  { %808 = vmatprep.subr.bf16.mxu0 %v1035_v0  ;;  %790 = vmatprep.subr.bf16.mxu1 %v1035_v0  ;;  %v904_v13 = vld [vmem:[#allocation7 + $0x40] sm:$0xff]   ;;  %v905_v14 = vld [vmem:[#allocation7 + $0x48] sm:$0xff]   ;;  %v906_v15 = vld [vmem:[#allocation7 + $0x50] sm:$0xff]   ;;  %p1003_p10 = scmp.ne.s32.totalorder %s679_s1, %s1002_s11  ;;  %p1008_p12 = scmp.lt.s32.totalorder %s1002_s11, %s1002_s11 }
  0x3b   :  { %v907_v16 = vld [vmem:[#allocation7 + $0x58] sm:$0xff]   ;;  %v908_v17 = vld [vmem:[#allocation7 + $0x60] sm:$0xff]   ;;  %v909_v18 = vld [vmem:[#allocation7 + $0x68] sm:$0xff]  }
  0x3c   :  { %785 = vmatmul.mubr.msk.bf16.vlgmr.msra.gmra.mrb[0].mxu0 %vm64_vm2, %v57_v4  ;;  %v688_v19 = vld [vmem:[%s1185_s3] ss:$0 sm:$0xff]  ;;  %v911_v28 = vld [vmem:[#allocation7 + $0x78] sm:$0xff]   ;;  %v912_v29 = vld [vmem:[#allocation7 + $0x80] sm:$0xff]   ;;  %p1009_p13 = por %p1008_p12, %p1007_p11 }
  0x3d   :  { %824 = vmatprep.mubr.msk.bf16.mxu0 %vm1036_vm0, %v1035_v0  ;;  %791 = vmatpush3.bf16.msra.mxu1 %v897_v6  ;;  %v910_v27 = vld [vmem:[#allocation7 + $0x70] sm:$0xff]   ;;  %v913_v30 = vld [vmem:[#allocation7 + $0x88] sm:$0xff]   ;;  %v915_v32 = vld [vmem:[#allocation7 + $0x98] sm:$0xff]  }
  0x3e   :  { %792 = vmatprep.subr.bf16.mxu1 %v1035_v0  ;;  %809 = vmatpush3.bf16.msra.mxu0 %v904_v13  ;;  %v914_v31 = vld [vmem:[#allocation7 + $0x90] sm:$0xff]   ;;  %v916_v33 = vld [vmem:[#allocation7 + $0xa0] sm:$0xff]   ;;  %v917_v34 = vld [vmem:[#allocation7 + $0xa8] sm:$0xff]   ;;  %p1010_p0 = pnand %p1009_p13, %p1003_p10 }
  0x3f   :  { %810 = vmatprep.subr.bf16.mxu0 %v1035_v0  ;;  %v690_v35 = vld [vmem:[%s1185_s3 + $0x1] ss:$0 sm:$0xff]  ;;  %v919_v44 = vld [vmem:[#allocation7 + $0xb8] sm:$0xff]   ;;  %v920_v45 = vld [vmem:[#allocation7 + $0xc0] sm:$0xff]  }
  0x40   :  { %v918_v43 = vld [vmem:[#allocation7 + $0xb0] sm:$0xff]   ;;  %v921_v46 = vld [vmem:[#allocation7 + $0xc8] sm:$0xff]   ;;  %v923_v48 = vld [vmem:[#allocation7 + $0xd8] sm:$0xff]  }
  0x41   :  { %793 = vmatpush3.bf16.msra.mxu1 %v898_v7  ;;  %v922_v47 = vld [vmem:[#allocation7 + $0xd0] sm:$0xff]   ;;  %v924_v49 = vld [vmem:[#allocation7 + $0xe0] sm:$0xff]   ;;  %v925_v50 = vld [vmem:[#allocation7 + $0xe8] sm:$0xff]  }
  0x42   :  { %794 = vmatprep.subr.bf16.mxu1 %v1035_v0  ;;  %811 = vmatpush3.bf16.msra.mxu0 %v905_v14  ;;  %v699_v51 = vld [vmem:[%s1185_s3 + $0x2] ss:$0 sm:$0xff]  ;;  %v927_v60 = vld [vmem:[#allocation7 + $0xf8] sm:$0xff]   ;;  %v928_v61 = vld [vmem:[#allocation7 + $0x100] sm:$0xff]  }
  0x43   :  { %812 = vmatprep.subr.bf16.mxu0 %v1035_v0  ;;  %v926_v59 = vld [vmem:[#allocation7 + $0xf0] sm:$0xff]   ;;  %v929_v62 = vld [vmem:[#allocation7 + $0x108] sm:$0xff]   ;;  %v931_v1 = vld [vmem:[#allocation7 + $0x118] sm:$0xff]  }
  0x44   :  { %v930_v63 = vld [vmem:[#allocation7 + $0x110] sm:$0xff]   ;;  %v932_v2 = vld [vmem:[#allocation7 + $0x120] sm:$0xff]   ;;  %v933_v3 = vld [vmem:[#allocation7 + $0x128] sm:$0xff]  }
  0x45   :  { %795 = vmatpush3.bf16.msra.mxu1 %v899_v8  ;;  %v708_v4 = vld [vmem:[%s1185_s3 + $0x3] ss:$0 sm:$0xff]  ;;  %v935_v13 = vld [vmem:[#allocation7 + $0x138] sm:$0xff]  }
  0x46   :  { %796 = vmatprep.subr.bf16.mxu1 %v1035_v0  ;;  %813 = vmatpush3.bf16.msra.mxu0 %v906_v15  ;;  %v717_v14 = vld [vmem:[%s1185_s3 + $0x4] ss:$0 sm:$0xff] }
  0x47   :  { %814 = vmatprep.subr.bf16.mxu0 %v1035_v0 }
  0x49   :  { %797 = vmatpush3.bf16.msra.mxu1 %v900_v9 }
  0x4a   :  { %798 = vmatprep.subr.bf16.mxu1 %v1035_v0  ;;  %815 = vmatpush3.bf16.msra.mxu0 %v907_v16 }
  0x4b   :  { %816 = vmatprep.subr.bf16.mxu0 %v1035_v0 }
  0x4d   :  { %799 = vmatpush3.bf16.msra.mxu1 %v901_v10 }
  0x4e   :  { %800 = vmatprep.subr.bf16.mxu1 %v1035_v0  ;;  %817 = vmatpush3.bf16.msra.mxu0 %v908_v17 }
  0x4f   :  { %818 = vmatprep.subr.bf16.mxu0 %v1035_v0 }
  0x51   :  { %801 = vmatpush3.bf16.msra.mxu1 %v902_v11 }
  0x52   :  { %802 = vmatprep.subr.bf16.mxu1 %v1035_v0  ;;  %819 = vmatpush3.bf16.msra.mxu0 %v909_v18 }
  0x53   :  { %820 = vmatprep.subr.bf16.mxu0 %v1035_v0 }
  0x55   :  { %803 = vmatpush3.bf16.msra.mxu1 %v903_v12  ;;  %v934_v12 = vld [vmem:[#allocation7 + $0x130] sm:$0xff]  }
  0x56   :  { %828 = vmatprep.subr.bf16.mxu1 %v1035_v0  ;;  %821 = vmatpush3.bf16.msra.mxu0 %v910_v27 }
  0x57   :  { %822 = vmatprep.subr.bf16.mxu0 %v1035_v0 }
  0x5a   :  { %823 = vmatpush3.bf16.msra.mxu0 %v911_v28 }
  0x5b   :  { %848 = vmatprep.subr.bf16.mxu0 %v1035_v0 }
 0x10f   :  { %v106_v20 = vpop.f32.mrb[0].mxu0 }
 0x110   :  { %v107_v21 = vadd.f32 %v688_v19, %v106_v20  ;;  %v786_v22 = vpop.f32.mrb[1].mxu0 }
 0x111   :  { %v109_v23 = vpop.f32.mrb[2].mxu0  ;;  %v726_v22 = vld [vmem:[%s1185_s3 + $0x5] ss:$0 sm:$0xff] }
 0x112   :  { %v112_v24 = vmax.f32 %v107_v21, 0.0  ;;  %v787_v25 = vpop.f32.mrb[3].mxu0 }
 0x114   :  { %v113_v26 = vpack.c.bf16 %v112_v24, %v112_v24 }
 0x116   :  { %805 = vmatmul.mubr.bf16.vlgmr.msra.gmra.mrb[0].mxu1 %v113_v26 }
 0x117   :  { %844 = vmatprep.mubr.msk.bf16.mxu1 %vm1036_vm0, %v1035_v0  ;;  %829 = vmatpush3.bf16.msra.mxu1 %v912_v29 }
 0x118   :  { %830 = vmatprep.subr.bf16.mxu1 %v1035_v0 }
 0x11b   :  { %831 = vmatpush3.bf16.msra.mxu1 %v913_v30 }
 0x11c   :  { %832 = vmatprep.subr.bf16.mxu1 %v1035_v0 }
 0x11f   :  { %833 = vmatpush3.bf16.msra.mxu1 %v914_v31 }
 0x120   :  { %834 = vmatprep.subr.bf16.mxu1 %v1035_v0 }
 0x123   :  { %835 = vmatpush3.bf16.msra.mxu1 %v915_v32 }
 0x124   :  { %836 = vmatprep.subr.bf16.mxu1 %v1035_v0 }
 0x127   :  { %837 = vmatpush3.bf16.msra.mxu1 %v916_v33 }
 0x128   :  { %838 = vmatprep.subr.bf16.mxu1 %v1035_v0 }
 0x12b   :  { %839 = vmatpush3.bf16.msra.mxu1 %v917_v34 }
 0x12c   :  { %840 = vmatprep.subr.bf16.mxu1 %v1035_v0 }
 0x12f   :  { %841 = vmatpush3.bf16.msra.mxu1 %v918_v43 }
 0x130   :  { %842 = vmatprep.subr.bf16.mxu1 %v1035_v0 }
 0x133   :  { %843 = vmatpush3.bf16.msra.mxu1 %v919_v44 }
 0x134   :  { %868 = vmatprep.subr.bf16.mxu1 %v1035_v0 }
 0x1e9   :  { %v217_v36 = vpop.f32.mrb[0].mxu1 }
 0x1ea   :  { %v218_v37 = vadd.f32 %v690_v35, %v217_v36  ;;  %v806_v38 = vpop.f32.mrb[1].mxu1 }
 0x1eb   :  { %v220_v39 = vpop.f32.mrb[2].mxu1 }
 0x1ec   :  { %v223_v40 = vmax.f32 %v218_v37, 0.0  ;;  %v807_v41 = vpop.f32.mrb[3].mxu1 }
 0x1ee   :  { %v224_v42 = vpack.c.bf16 %v223_v40, %v223_v40 }
 0x1f0   :  { %825 = vmatmul.mubr.bf16.vlgmr.msra.gmra.mrb[4].mxu0 %v224_v42 }
 0x1f1   :  { %864 = vmatprep.mubr.msk.bf16.mxu0 %vm1036_vm0, %v1035_v0  ;;  %849 = vmatpush3.bf16.msra.mxu0 %v920_v45 }
 0x1f2   :  { %850 = vmatprep.subr.bf16.mxu0 %v1035_v0 }
 0x1f5   :  { %851 = vmatpush3.bf16.msra.mxu0 %v921_v46 }
 0x1f6   :  { %852 = vmatprep.subr.bf16.mxu0 %v1035_v0 }
 0x1f9   :  { %853 = vmatpush3.bf16.msra.mxu0 %v922_v47 }
 0x1fa   :  { %854 = vmatprep.subr.bf16.mxu0 %v1035_v0 }
 0x1fd   :  { %855 = vmatpush3.bf16.msra.mxu0 %v923_v48 }
 0x1fe   :  { %856 = vmatprep.subr.bf16.mxu0 %v1035_v0 }
 0x201   :  { %857 = vmatpush3.bf16.msra.mxu0 %v924_v49 }
 0x202   :  { %858 = vmatprep.subr.bf16.mxu0 %v1035_v0 }
 0x205   :  { %859 = vmatpush3.bf16.msra.mxu0 %v925_v50 }
 0x206   :  { %860 = vmatprep.subr.bf16.mxu0 %v1035_v0 }
 0x209   :  { %861 = vmatpush3.bf16.msra.mxu0 %v926_v59 }
 0x20a   :  { %862 = vmatprep.subr.bf16.mxu0 %v1035_v0 }
 0x20d   :  { %863 = vmatpush3.bf16.msra.mxu0 %v927_v60 }
 0x2c3   :  { %v329_v52 = vpop.f32.mrb[4].mxu0 }
 0x2c4   :  { %v330_v53 = vadd.f32 %v699_v51, %v329_v52  ;;  %v826_v54 = vpop.f32.mrb[5].mxu0 }
 0x2c5   :  { %v332_v55 = vpop.f32.mrb[6].mxu0 }
 0x2c6   :  { %v335_v56 = vmax.f32 %v330_v53, 0.0  ;;  %v827_v57 = vpop.f32.mrb[7].mxu0 }
 0x2c8   :  { %v336_v58 = vpack.c.bf16 %v335_v56, %v335_v56 }
 0x2ca   :  { %845 = vmatmul.mubr.bf16.vlgmr.msra.gmra.mrb[4].mxu1 %v336_v58 }
 0x2cb   :  { %884 = vmatprep.mubr.msk.bf16.mxu1 %vm1036_vm0, %v1035_v0  ;;  %869 = vmatpush3.bf16.msra.mxu1 %v928_v61 }
 0x2cc   :  { %870 = vmatprep.subr.bf16.mxu1 %v1035_v0 }
 0x2cf   :  { %871 = vmatpush3.bf16.msra.mxu1 %v929_v62 }
 0x2d0   :  { %872 = vmatprep.subr.bf16.mxu1 %v1035_v0 }
 0x2d3   :  { %873 = vmatpush3.bf16.msra.mxu1 %v930_v63 }
 0x2d4   :  { %874 = vmatprep.subr.bf16.mxu1 %v1035_v0 }
 0x2d7   :  { %875 = vmatpush3.bf16.msra.mxu1 %v931_v1 }
 0x2d8   :  { %876 = vmatprep.subr.bf16.mxu1 %v1035_v0 }
 0x2db   :  { %877 = vmatpush3.bf16.msra.mxu1 %v932_v2 }
 0x2dc   :  { %878 = vmatprep.subr.bf16.mxu1 %v1035_v0 }
 0x2df   :  { %879 = vmatpush3.bf16.msra.mxu1 %v933_v3 }
 0x2e0   :  { %880 = vmatprep.subr.bf16.mxu1 %v1035_v0 }
 0x2e3   :  { %881 = vmatpush3.bf16.msra.mxu1 %v934_v12 }
 0x2e4   :  { %882 = vmatprep.subr.bf16.mxu1 %v1035_v0 }
 0x2e7   :  { %883 = vmatpush3.bf16.msra.mxu1 %v935_v13 }
 0x39d   :  { %v441_v5 = vpop.f32.mrb[4].mxu1 }
 0x39e   :  { %v442_v6 = vadd.f32 %v708_v4, %v441_v5  ;;  %v846_v7 = vpop.f32.mrb[5].mxu1 }
 0x39f   :  { %v444_v8 = vpop.f32.mrb[6].mxu1 }
 0x3a0   :  { %v447_v9 = vmax.f32 %v442_v6, 0.0  ;;  %v847_v10 = vpop.f32.mrb[7].mxu1 }
 0x3a2   :  { %v448_v11 = vpack.c.bf16 %v447_v9, %v447_v9 }
 0x3a4   :  { %865 = vmatmul.mubr.bf16.vlgmr.msra.gmra.mrb[8].mxu0 %v448_v11 }
 0x477   :  { %v553_v15 = vpop.f32.mrb[8].mxu0 }
 0x478   :  { %v554_v16 = vadd.f32 %v717_v14, %v553_v15  ;;  %v866_v17 = vpop.f32.mrb[9].mxu0 }
 0x479   :  { %v556_v18 = vpop.f32.mrb[10].mxu0 }
 0x47a   :  { %v559_v19 = vmax.f32 %v554_v16, 0.0  ;;  %v867_v20 = vpop.f32.mrb[11].mxu0 }
 0x47c   :  { %v560_v21 = vpack.c.bf16 %v559_v19, %v559_v19 }
 0x47e   :  { %885 = vmatmul.mubr.bf16.vlgmr.msra.gmra.mrb[8].mxu1 %v560_v21 }
 0x551   :  { %v665_v0 = vpop.f32.mrb[8].mxu1 }
 0x552   :  { %v666_v23 = vadd.f32 %v726_v22, %v665_v0  ;;  %v886_v24 = vpop.f32.mrb[9].mxu1 }
 0x553   :  { %v668_v25 = vpop.f32.mrb[10].mxu1 }
 0x554   :  { %671 = vst [vmem:[#allocation8] sm:$0xff] %v666_v23  ;;  %v887_v26 = vpop.f32.mrb[11].mxu1 }
 0x555   :  { %1013 = shalt.err (!%p1010_p0)
}
 0x556   :  { %s1014_s3 = scalar_lea.hbm %s1186_s4, 128 }
 0x557   :  { %p1015_p1 = scmp.ne.s32.totalorder %s1186_s4, %s1014_s3  ;;  %p1018_p2 = scmp.lt.u32.totalorder %s1014_s3, %s1186_s4 }
 0x559   :  { %p1020_p3 = pnand %p1018_p2, %p1015_p1 }
 0x55b   :  { %1023 = shalt.err (!%p1020_p3)
}
 0x55c   :  { %681 = dma.vmem_to_hbm [thread:$0]  %s679_s1, 128, %s1186_s4, [#allocation4]  }
 0x55d   :  { %1028 = dma.done.wait [#allocation4], 128  }
 0x55e   :  { %1029 = vsyncadd [#allocation4], 4294967168 }
 0x55f   :  { %685 = vsyncpa [#allocation3], 1 }
 0x560   :  { %686 = vsyncpa [#allocation6], 1 }
 0x561   :  { %687 = vsyncpa [#allocation4], 1 }

</bundles_post_ra>
